<compile_context>
chip_gen: v7x
topology: tpu7x:2x2x1
jax: 0.10.0
libtpu: 0.0.40
codegen_flags: <defaults>
</compile_context>

<pallas_src>
import jax
import jax.numpy as jnp
from jax.experimental import pallas as pl
from jax.experimental.pallas import tpu as pltpu


def _normalize_kernel(stats_ref, img_ref, out_ref):
    # stats_ref : VMEM (R, 2) f32  -- column 0 = scale (1/std), column 1 = bias (-mean/std)
    # img_ref / out_ref : VMEM (R, L) lane-dense tiles
    stats = stats_ref[...]
    scale = stats[:, 0:1]
    bias = stats[:, 1:2]
    x = img_ref[...].astype(jnp.float32)
    out_ref[...] = (x * scale + bias).astype(out_ref.dtype)


def normalization(img: jax.Array, mean: jax.Array, std: jax.Array,
                  donate_img: bool = False) -> jax.Array:
    """(img - mean[:, None, None]) / std[:, None, None] for NCHW `img`."""
    N, C, H, W = img.shape
    mean = jnp.asarray(mean)
    std = jnp.asarray(std)
    assert mean.shape == (C,) and std.shape == (C,)
    NC, HW = N * C, H * W
    dtype = img.dtype
    itemsize = jnp.dtype(dtype).itemsize

    # Fused per-row (one row per (n, c)) statistics, kept in f32 regardless of
    # the image dtype:  out = img * scale + bias  with scale = 1/std,
    # bias = -mean/std.  (Reciprocal + fold hoisted to this tiny wrapper.)
    scale_c = 1.0 / std.astype(jnp.float32)
    bias_c = -mean.astype(jnp.float32) * scale_c
    stats = jnp.stack([jnp.tile(scale_c, N), jnp.tile(bias_c, N)], axis=1)  # (NC, 2) f32

    img2d = img.reshape(NC, HW)  # contiguous reshape, free

    # --- Tile selection: fixed aligned tiles + cdiv grid (ragged blocks are masked) ---
    sublane = max(8, 32 // itemsize)          # f32 -> 8, bf16 -> 16, int8/fp8 -> 32
    # Lane-dense last dim: full extent when small, else a large multiple of 128.
    L = HW if HW <= 2048 else 2048
    # Cap tiles at ~2 MiB: double-buffered (in + out) = ~8 MiB, safe on every
    # generation (v5e 16 MiB default scoped limit, v7x 64 MiB physical VMEM).
    target_bytes = 2 * 1024 * 1024
    r_target = max(1, target_bytes // max(1, L * itemsize))
    if NC <= sublane:
        R = NC                                 # full extent -> always legal
    else:
        R = max(sublane, (min(r_target, NC) // sublane) * sublane)

    # v7x megacore: make sure at least one "parallel" axis has extent >= 2
    # when the workload is large enough to split.
    if pl.cdiv(NC, R) == 1 and pl.cdiv(HW, L) == 1 and NC >= 2 * sublane:
        R = max(sublane, ((NC // 2) // sublane) * sublane)

    grid = (pl.cdiv(NC, R), pl.cdiv(HW, L))    # j (columns) is fastest-varying

    kwargs = {}
    if donate_img:
        kwargs["input_output_aliases"] = {1: 0}   # img2d is input index 1

    out2d = pl.pallas_call(
        _normalize_kernel,
        out_shape=jax.ShapeDtypeStruct((NC, HW), dtype),
        grid=grid,
        in_specs=[
            pl.BlockSpec((R, 2), lambda i, j: (i, 0)),   # fused scale/bias rows (f32)
            pl.BlockSpec((R, L), lambda i, j: (i, j)),   # image tile
        ],
        out_specs=pl.BlockSpec((R, L), lambda i, j: (i, j)),
        compiler_params=pltpu.CompilerParams(
            dimension_semantics=("parallel", "parallel"),
            vmem_limit_bytes=32 * 1024 * 1024,
        ),
        **kwargs,
    )(stats, img2d)

    return out2d.reshape(N, C, H, W)


if __name__ == "__main__":
    key = jax.random.PRNGKey(0)

    # Small shapes consistent with the module's forward: NCHW image.
    N, C, H, W = 2, 4, 16, 16
    img = jax.random.uniform(key, (N, C, H, W), dtype=jnp.float32)

    # Deterministic per-channel statistics (as a PyTorch user would pass lists).
    mean = jnp.array([0.485, 0.456, 0.406, 0.5], dtype=jnp.float32)
    std = jnp.array([0.229, 0.224, 0.225, 0.25], dtype=jnp.float32)

    out = normalization(img, mean, std)
    out = jax.block_until_ready(out)

    # Reference check in plain JAX (mirrors PyTorch broadcasting semantics).
    ref = (img - mean[None, :, None, None]) / std[None, :, None, None]
    assert out.shape == (N, C, H, W)
    # Kernel uses img * (1/std) + (-mean/std): identical math up to a few ulps.
    assert jnp.allclose(out, ref, atol=1e-5, rtol=1e-5)

    print("KERNEL_OK")
</pallas_src>

<mosaic_0001>
module attributes {stable_mosaic.version = 11 : i64} {
  func.func @_normalize_kernel(%arg0: i32, %arg1: i32, %arg2: memref<8x2xf32, #tpu.memory_space<vmem>>, %arg3: memref<8x256xf32, #tpu.memory_space<vmem>>, %arg4: memref<8x256xf32, #tpu.memory_space<vmem>>) attributes {dimension_semantics = [#tpu.dimension_semantics<parallel>, #tpu.dimension_semantics<parallel>], iteration_bounds = array<i64: 1, 1>, scalar_prefetch = 0 : i64, scratch_operands = 0 : i64, tpu.core_type = #tpu.core_type<tc>, window_params = [{transform_indices = @transform_0, window_bounds = array<i64: 8, 2>}, {transform_indices = @transform_1, window_bounds = array<i64: 8, 256>}, {transform_indices = @transform_2, window_bounds = array<i64: 8, 256>}]} {
    %c0 = arith.constant 0 : index
    %c0_0 = arith.constant 0 : index
    %0 = vector.load %arg2[%c0, %c0_0] : memref<8x2xf32, #tpu.memory_space<vmem>>, vector<8x2xf32>
    %1 = vector.extract_strided_slice %0 {offsets = [0, 0], sizes = [8, 1], strides = [1, 1]} : vector<8x2xf32> to vector<8x1xf32>
    %2 = vector.extract_strided_slice %0 {offsets = [0, 1], sizes = [8, 1], strides = [1, 1]} : vector<8x2xf32> to vector<8x1xf32>
    %c0_1 = arith.constant 0 : index
    %c0_2 = arith.constant 0 : index
    %3 = vector.load %arg3[%c0_1, %c0_2] : memref<8x256xf32, #tpu.memory_space<vmem>>, vector<8x256xf32>
    %4 = vector.broadcast %1 : vector<8x1xf32> to vector<8x256xf32>
    %5 = arith.mulf %3, %4 : vector<8x256xf32>
    %6 = vector.broadcast %2 : vector<8x1xf32> to vector<8x256xf32>
    %7 = arith.addf %5, %6 : vector<8x256xf32>
    %c0_3 = arith.constant 0 : index
    %c0_4 = arith.constant 0 : index
    %8 = vector.load %arg4[%c0_3, %c0_4] : memref<8x256xf32, #tpu.memory_space<vmem>>, vector<8x256xf32>
    tpu.vector_store %arg4[%c0_3, %c0_4], %7 {strides = array<i32>} : memref<8x256xf32, #tpu.memory_space<vmem>>, vector<8x256xf32>,
    return
  }
  func.func @transform_0(%arg0: i32, %arg1: i32) -> (i32, i32) {
    %c0_i32 = arith.constant 0 : i32
    %c0_i32_0 = arith.constant 0 : i32
    return %arg0, %c0_i32 : i32, i32
  }
  func.func @transform_1(%arg0: i32, %arg1: i32) -> (i32, i32) {
    %c0_i32 = arith.constant 0 : i32
    return %arg0, %arg1 : i32, i32
  }
  func.func @transform_2(%arg0: i32, %arg1: i32) -> (i32, i32) {
    %c0_i32 = arith.constant 0 : i32
    return %arg0, %arg1 : i32, i32
  }
}

</mosaic_0001>

<bundles_post_ra>
// kernel: tpu_custom_call.1
= control target key start
LH: loop header
LB: loop body
LE: loop exit
PB: predicated region body
PF: predicated region fallthrough
CT: control target
= control target key end

     0   :  { %7 = vsyncpa [#allocation3], 0  ;;  %s157_s0 = inlined_call_operand.vmem [shape: f32[8,2], index: 0, kind: input, shape index: {}]   ;;  %s158_s1 = inlined_call_operand.hbm [shape: f32[8,256], index: 1, kind: input, shape index: {}]   ;;  %s159_s2 = inlined_call_operand.hbm [shape: f32[8,256], index: 2, kind: output, shape index: {}]  }
   0x1   :  { %8 = vsyncpa [#allocation4], 0  ;;  %s111_s9 = smov [#allocation2]   ;;  %s63_s13 = scalar_lea.hbm %s158_s1, 256 }
   0x2   :  { %s17_s10 = sshll.u32 %s111_s9, 4  ;;  %p64_p0 = scmp.ne.s32.totalorder %s158_s1, %s63_s13  ;;  %s18_s10 = int_to_ptr.vmem [resolvable:$true] %s17_s10 }
   0x3   :  { %p67_p1 = scmp.lt.u32.totalorder %s63_s13, %s158_s1 }
   0x5   :  { %p69_p2 = pnand %p67_p1, %p64_p0 }
   0x7   :  { %72 = shalt.err (!%p69_p2)
}
   0x8   :  { %s73_s18 = scalar_lea.vmem %s18_s10, 256  ;;  %p78_p4 = scmp.lt.s32.totalorder %s18_s10, %s18_s10 }
   0x9   :  { %p74_p3 = scmp.ne.s32.totalorder %s18_s10, %s73_s18  ;;  %p79_p5 = scmp.lt.s32.totalorder %s73_s18, %s73_s18 }
   0xb   :  { %p80_p6 = por %p79_p5, %p78_p4 }
   0xd   :  { %p81_p7 = pnand %p80_p6, %p74_p3 }
   0xf   :  { %84 = shalt.err (!%p81_p7)
}
  0x10   :  { %20 = dma.hbm_to_vmem [thread:$0]  %s158_s1, 256, %s18_s10, [#allocation3]  }
  0x11   :  { %107 = dma.done.wait [#allocation3], 256  }
  0x12   :  { %108 = vsyncadd [#allocation3], 4294967040  ;;  %v112_v0 = vmov 0   ;;  %v24_v1 = vld [vmem:[%s157_s0] sm:$0xff]  ;;  %v113_v2 = vmov 1   ;;  %v26_v5 = vld [vmem:[#allocation2 + $0x8] sm:$0xff] }
  0x13   :  { %61 = vset.pattern.permute.xlu0 %v112_v0  ;;  %v25_v4 = vld [vmem:[#allocation2] sm:$0xff]  ;;  %s114_s23 = smov [#allocation5]  }
  0x14   :  { %29 = vperm.xlu0 %61, %v24_v1   ;;  %s48_s24 = sshll.u32 %s114_s23, 4  ;;  %s49_s24 = int_to_ptr.vmem [resolvable:$true] %s48_s24 }
  0x15   :  { %s85_s1 = scalar_lea.vmem %s49_s24, 256  ;;  %p90_p9 = scmp.lt.s32.totalorder %s49_s24, %s49_s24 }
  0x16   :  { %p86_p8 = scmp.ne.s32.totalorder %s49_s24, %s85_s1  ;;  %p91_p10 = scmp.lt.s32.totalorder %s85_s1, %s85_s1 }
  0x18   :  { %62 = vset.pattern.permute.xlu0 %v113_v2  ;;  %p92_p11 = por %p91_p10, %p90_p9 }
  0x19   :  { %35 = vperm.xlu0 %62, %v24_v1  }
  0x1a   :  { %p93_p12 = pnand %p92_p11, %p86_p8 }
  0x93   :  { %v30_v3 = vpop.permute.xlu0 %29 }
  0x94   :  { %v32_v6 = vmul.f32 %v30_v3, %v25_v4  ;;  %v33_v7 = vmul.f32 %v30_v3, %v26_v5 }
  0x98   :  { %v36_v8 = vpop.permute.xlu0 %35 }
  0x99   :  { %v38_v9 = vadd.f32 %v36_v8, %v32_v6  ;;  %v39_v10 = vadd.f32 %v36_v8, %v33_v7 }
  0x9b   :  { %40 = vst [vmem:[#allocation5] sm:$0xff] %v38_v9  ;;  %41 = vst [vmem:[#allocation5 + $0x8] sm:$0xff] %v39_v10 }
  0x9c   :  { %96 = shalt.err (!%p93_p12)
}
  0x9d   :  { %s97_s26 = scalar_lea.hbm %s159_s2, 256 }
  0x9e   :  { %p98_p13 = scmp.ne.s32.totalorder %s159_s2, %s97_s26  ;;  %p101_p0 = scmp.lt.u32.totalorder %s97_s26, %s159_s2 }
  0xa0   :  { %p103_p1 = pnand %p101_p0, %p98_p13 }
  0xa2   :  { %106 = shalt.err (!%p103_p1)
}
  0xa3   :  { %51 = dma.vmem_to_hbm [thread:$0]  %s49_s24, 256, %s159_s2, [#allocation4]  }
  0xa4   :  { %109 = dma.done.wait [#allocation4], 256  }
  0xa5   :  { %110 = vsyncadd [#allocation4], 4294967040 }
  0xa6   :  { %55 = vsyncpa [#allocation3], 1 }
  0xa7   :  { %56 = vsyncpa [#allocation4], 1 }

</bundles_post_ra>
